<compile_context>
chip_gen: v7x
topology: tpu7x:2x2x1
jax: 0.10.0
libtpu: 0.0.40
codegen_flags: <defaults>
</compile_context>

<pallas_src>
import functools

import jax
import jax.numpy as jnp
from jax import lax
from jax.experimental import pallas as pl
from jax.experimental.pallas import tpu as pltpu


def _round_up(x, m):
    return ((x + m - 1) // m) * m


# ---------------------------------------------------------------------------
# Fused two-layer ConvBlock kernel
# ---------------------------------------------------------------------------
def _conv_block_kernel(x_ref, mask_ref, w1_ref, b1_ref, w2_ref, b2_ref, o_ref, *, W):
    """Two fused (conv3x3 p=1 -> BN(eval) -> ReLU) layers on one lane-flattened slab.

    x_ref   : [Cin_p, L]        bf16, L = images_per_step*H*W, lane = n*HW + y*W + x
    mask_ref: [9, 1, L]         f32, precomputed 1/0 boundary mask per tap (k = ky*3+kx)
    w1_ref  : [C1_p, 9*Cin_p]   bf16, BN scale folded in, column = k*Cin_p + c
    b1_ref  : [C1_p, 1]         f32, folded bias (conv bias + BN shift)
    w2_ref  : [C2,   9*C1_p]    bf16
    b2_ref  : [C2, 1]           f32
    o_ref   : [C2, L]           out dtype (bf16 by default)
    """
    L = x_ref.shape[-1]

    def im2col(a):
        # a: [C, L] f32  ->  [9*C, L] bf16 im2col patches (row order k*C + c).
        taps = []
        for k in range(9):
            dy, dx = k // 3 - 1, k % 3 - 1
            s = dy * W + dx                       # flattened lane shift of this tap
            if s % L == 0:
                shifted = a
            else:
                # out[l] = a[(l + s) mod L]; wrap-around / cross-image lanes are
                # exactly the ones zeroed by the precomputed boundary mask.
                shifted = pltpu.roll(a, shift=(-s) % L, axis=1)
            taps.append(shifted * mask_ref[k])    # [C, L] * [1, L]
        # All pieces have a multiple-of-8 sublane count and f32 dtype -> tile-aligned
        # concatenation; pack to bf16 once for the MXU.
        return jnp.concatenate(taps, axis=0).astype(jnp.bfloat16)

    a0 = x_ref[...].astype(jnp.float32)
    h1 = jnp.dot(w1_ref[...], im2col(a0), preferred_element_type=jnp.float32)
    a1 = jnp.maximum(h1 + b1_ref[...], 0.0)        # [C1_p, L] f32, never leaves VMEM
    h2 = jnp.dot(w2_ref[...], im2col(a1), preferred_element_type=jnp.float32)
    o_ref[...] = jnp.maximum(h2 + b2_ref[...], 0.0).astype(o_ref.dtype)


# ---------------------------------------------------------------------------
# Host-side helpers
# ---------------------------------------------------------------------------
def _fold_bn(w, b, gamma, beta, run_mean, run_var, eps=1e-5):
    """Fold eval-mode BN into conv: y = conv(x, w*s) + ((b - mean)*s + beta), s = g/sqrt(v+eps)."""
    s = gamma / jnp.sqrt(run_var + eps)
    w_f = w * s[:, None, None, None]
    b_f = (b - run_mean) * s + beta
    return w_f, b_f


def _tap_weights(w_f, b_f, in_pad, out_pad):
    """[O,I,3,3] folded weights -> ([O_p, 9*I_p] bf16, [O_p,1] f32), column = k*I_p + i."""
    O, I = w_f.shape[0], w_f.shape[1]
    w_p = jnp.pad(w_f, ((0, out_pad - O), (0, in_pad - I), (0, 0), (0, 0)))
    b_p = jnp.pad(b_f, ((0, out_pad - O),))
    w2d = jnp.transpose(w_p, (0, 2, 3, 1)).reshape(out_pad, 9 * in_pad).astype(jnp.bfloat16)
    return w2d, b_p.reshape(out_pad, 1).astype(jnp.float32)


def _boundary_mask(H, W, nb):
    """[9, 1, nb*H*W] f32 multiplicative mask: 1.0 where tap k = (ky*3+kx) is in-bounds."""
    HW = H * W
    pos = jnp.arange(nb * HW, dtype=jnp.int32) % HW
    yy, xx = pos // W, pos % W
    masks = []
    for k in range(9):
        dy, dx = k // 3 - 1, k % 3 - 1
        masks.append((yy + dy >= 0) & (yy + dy < H) & (xx + dx >= 0) & (xx + dx < W))
    return jnp.stack(masks, axis=0).astype(jnp.float32).reshape(9, 1, nb * HW)


# ---------------------------------------------------------------------------
# Wrappers
# ---------------------------------------------------------------------------
def conv_block_lanes(x_lanes, params, *, H, W, eps=1e-5, images_per_step=None,
                     out_dtype=jnp.bfloat16):
    """Fast path: input/output stay in the lane-flattened [C, N*H*W] layout.

    Chained ConvBlocks should call this directly to avoid NCHW<->lanes HBM transposes.
    """
    C_in, n_lanes = x_lanes.shape
    HW = H * W
    assert n_lanes % HW == 0
    N = n_lanes // HW
    nb = N if images_per_step is None else images_per_step
    assert N % nb == 0
    L = nb * HW
    assert L > W + 1, "roll+mask im2col requires L > W + 1"
    assert nb == N or L % 128 == 0, "per-step lane count must be a multiple of 128"

    w1, b1, g1, be1, m1, v1 = params["layer1"]
    w2, b2, g2, be2, m2, v2 = params["layer2"]
    C1, C2 = w1.shape[0], w2.shape[0]
    Cin_p, C1_p = _round_up(C_in, 8), _round_up(C1, 8)

    w1f, b1f = _fold_bn(w1, b1, g1, be1, m1, v1, eps)
    w2f, b2f = _fold_bn(w2, b2, g2, be2, m2, v2, eps)
    w1_2d, b1c = _tap_weights(w1f, b1f, Cin_p, C1_p)     # [C1_p, 9*Cin_p], [C1_p, 1]
    w2_2d, b2c = _tap_weights(w2f, b2f, C1_p, C2)        # [C2,   9*C1_p ], [C2, 1]

    # Zero-pad input channels to a multiple of 8 and ship bf16 (halves input bytes).
    x_p = jnp.pad(x_lanes, ((0, Cin_p - C_in), (0, 0))).astype(jnp.bfloat16)
    mask = _boundary_mask(H, W, nb)                       # same for every grid step

    kernel = functools.partial(_conv_block_kernel, W=W)
    # NOTE: VMEM use here is tiny; when scaling (big L / channels) re-derive
    # images_per_step per generation and set CompilerParams(vmem_limit_bytes=...)
    # explicitly (v7x has only 64 MiB physical VMEM).
    return pl.pallas_call(
        kernel,
        out_shape=jax.ShapeDtypeStruct((C2, N * HW), out_dtype),
        grid_spec=pltpu.PrefetchScalarGridSpec(
            num_scalar_prefetch=0,
            grid=(N // nb,),
            in_specs=[
                pl.BlockSpec((Cin_p, L), lambda n: (0, n)),
                pl.BlockSpec((9, 1, L), lambda n: (0, 0, 0)),
                pl.BlockSpec((C1_p, 9 * Cin_p), lambda n: (0, 0)),
                pl.BlockSpec((C1_p, 1), lambda n: (0, 0)),
                pl.BlockSpec((C2, 9 * C1_p), lambda n: (0, 0)),
                pl.BlockSpec((C2, 1), lambda n: (0, 0)),
            ],
            out_specs=pl.BlockSpec((C2, L), lambda n: (0, n)),
        ),
        compiler_params=pltpu.CompilerParams(
            dimension_semantics=("parallel",)),
    )(x_p, mask, w1_2d, b1c, w2_2d, b2c)


def conv_block_forward(x, params, *, eps=1e-5, images_per_step=None,
                       out_dtype=jnp.bfloat16):
    """NCHW-compatible ConvBlock forward (eval-mode BN), both layers fused in one call."""
    N, C_in, H, W = x.shape
    x_lanes = jnp.transpose(x, (1, 0, 2, 3)).reshape(C_in, N * H * W)
    out = conv_block_lanes(x_lanes, params, H=H, W=W, eps=eps,
                           images_per_step=images_per_step, out_dtype=out_dtype)
    C2 = out.shape[0]
    return jnp.transpose(out.reshape(C2, N, H, W), (1, 0, 2, 3))


# ---------------------------------------------------------------------------
# References for correctness checks
# ---------------------------------------------------------------------------
def _ref_layer_f32(x, w, b, gamma, beta, run_mean, run_var, eps=1e-5):
    y = lax.conv_general_dilated(
        x, w, window_strides=(1, 1), padding=((1, 1), (1, 1)),
        dimension_numbers=("NCHW", "OIHW", "NCHW"))
    y = y + b.reshape(1, -1, 1, 1)
    y = (y - run_mean.reshape(1, -1, 1, 1)) / jnp.sqrt(run_var.reshape(1, -1, 1, 1) + eps)
    y = y * gamma.reshape(1, -1, 1, 1) + beta.reshape(1, -1, 1, 1)
    return jnp.maximum(y, 0.0)


def _ref_forward_f32(x, params):
    y = _ref_layer_f32(x, *params["layer1"])
    return _ref_layer_f32(y, *params["layer2"])


def _ref_layer_bf16(x, layer_params, eps=1e-5):
    # Mirrors the kernel's quantization points (bf16 conv operands, f32 accumulate/epilogue).
    w, b, gamma, beta, run_mean, run_var = layer_params
    w_f, b_f = _fold_bn(w, b, gamma, beta, run_mean, run_var, eps)
    y = lax.conv_general_dilated(
        x.astype(jnp.bfloat16), w_f.astype(jnp.bfloat16),
        window_strides=(1, 1), padding=((1, 1), (1, 1)),
        dimension_numbers=("NCHW", "OIHW", "NCHW"),
        preferred_element_type=jnp.float32)
    return jnp.maximum(y + b_f.reshape(1, -1, 1, 1), 0.0)


def _ref_forward_bf16(x, params):
    y = _ref_layer_bf16(x, params["layer1"])
    return _ref_layer_bf16(y, params["layer2"])


def _init_layer(key, in_ch, out_ch):
    k1, k2, k3, k4, k5 = jax.random.split(key, 5)
    fan_in = in_ch * 9
    bound = 1.0 / jnp.sqrt(fan_in)
    w = jax.random.uniform(k1, (out_ch, in_ch, 3, 3), jnp.float32, -bound, bound)
    b = jax.random.uniform(k2, (out_ch,), jnp.float32, -bound, bound)
    gamma = 1.0 + 0.1 * jax.random.normal(k3, (out_ch,), jnp.float32)
    beta = 0.1 * jax.random.normal(k4, (out_ch,), jnp.float32)
    run_mean = 0.05 * jax.random.normal(k5, (out_ch,), jnp.float32)
    run_var = jnp.ones((out_ch,), jnp.float32)
    return (w, b, gamma, beta, run_mean, run_var)


if __name__ == "__main__":
    key = jax.random.PRNGKey(0)
    kx, kp1, kp2 = jax.random.split(key, 3)

    N, in_ch, out_ch, H, W = 2, 4, 8, 16, 16
    x = jax.random.normal(kx, (N, in_ch, H, W), jnp.float32)

    params = {
        "layer1": _init_layer(kp1, in_ch, out_ch),
        "layer2": _init_layer(kp2, out_ch, out_ch),
    }

    out = jax.block_until_ready(conv_block_forward(x, params))
    assert out.shape == (N, out_ch, H, W)
    out_f32 = out.astype(jnp.float32)

    # Tight check vs a reference using the same bf16-operand / f32-accumulate path
    # (extra slack only for the bf16 rounding of the kernel's output store).
    ref_bf16 = jax.block_until_ready(_ref_forward_bf16(x, params))
    assert jnp.allclose(out_f32, ref_bf16, atol=2e-2, rtol=2e-2), \
        "Pallas output mismatch vs bf16-operand reference"

    # Loose check vs the literal fp32 PyTorch-order reference (bf16 rounding tolerance).
    ref_f32 = jax.block_until_ready(_ref_forward_f32(x, params))
    assert jnp.allclose(out_f32, ref_f32, atol=7.5e-2, rtol=7.5e-2), \
        "Pallas output mismatch vs f32 reference"

    print("KERNEL_OK")
</pallas_src>

<mosaic_0001>
module attributes {stable_mosaic.version = 11 : i64} {
  func.func @_conv_block_kernel(%arg0: i32, %arg1: memref<8x512xbf16, #tpu.memory_space<vmem>>, %arg2: memref<9x1x512xf32, #tpu.memory_space<vmem>>, %arg3: memref<8x72xbf16, #tpu.memory_space<vmem>>, %arg4: memref<8x1xf32, #tpu.memory_space<vmem>>, %arg5: memref<8x72xbf16, #tpu.memory_space<vmem>>, %arg6: memref<8x1xf32, #tpu.memory_space<vmem>>, %arg7: memref<8x512xbf16, #tpu.memory_space<vmem>>) attributes {dimension_semantics = [#tpu.dimension_semantics<parallel>], iteration_bounds = array<i64: 1>, scalar_prefetch = 0 : i64, scratch_operands = 0 : i64, tpu.core_type = #tpu.core_type<tc>, window_params = [{transform_indices = @transform_0, window_bounds = array<i64: 8, 512>}, {pipeline_mode = #tpu.pipeline_mode<synchronous>, transform_indices = @transform_1, window_bounds = array<i64: 9, 1, 512>}, {pipeline_mode = #tpu.pipeline_mode<synchronous>, transform_indices = @transform_2, window_bounds = array<i64: 8, 72>}, {pipeline_mode = #tpu.pipeline_mode<synchronous>, transform_indices = @transform_3, window_bounds = array<i64: 8, 1>}, {pipeline_mode = #tpu.pipeline_mode<synchronous>, transform_indices = @transform_4, window_bounds = array<i64: 8, 72>}, {pipeline_mode = #tpu.pipeline_mode<synchronous>, transform_indices = @transform_5, window_bounds = array<i64: 8, 1>}, {transform_indices = @transform_6, window_bounds = array<i64: 8, 512>}]} {
    %c0 = arith.constant 0 : index
    %c0_0 = arith.constant 0 : index
    %0 = vector.load %arg1[%c0, %c0_0] : memref<8x512xbf16, #tpu.memory_space<vmem>>, vector<8x512xbf16>
    %1 = arith.extf %0 : vector<8x512xbf16> to vector<8x512xf32>
    %c0_1 = arith.constant 0 : index
    %c0_2 = arith.constant 0 : index
    %2 = vector.load %arg3[%c0_1, %c0_2] : memref<8x72xbf16, #tpu.memory_space<vmem>>, vector<8x72xbf16>
    %c17_i32 = arith.constant 17 : i32
    %3 = tpu.dynamic_rotate %1 by %c17_i32 dim 1 : vector<8x512xf32>, i32 -> vector<8x512xf32>
    %c0_3 = arith.constant 0 : index
    %c0_4 = arith.constant 0 : index
    %c0_5 = arith.constant 0 : index
    %4 = vector.load %arg2[%c0_3, %c0_4, %c0_5] : memref<9x1x512xf32, #tpu.memory_space<vmem>>, vector<1x1x512xf32>
    %5 = vector.shape_cast %4 : vector<1x1x512xf32> to vector<1x512xf32>
    %6 = vector.broadcast %5 : vector<1x512xf32> to vector<8x512xf32>
    %7 = arith.mulf %3, %6 : vector<8x512xf32>
    %c16_i32 = arith.constant 16 : i32
    %8 = tpu.dynamic_rotate %1 by %c16_i32 dim 1 : vector<8x512xf32>, i32 -> vector<8x512xf32>
    %c1 = arith.constant 1 : index
    %c0_6 = arith.constant 0 : index
    %c0_7 = arith.constant 0 : index
    %9 = vector.load %arg2[%c1, %c0_6, %c0_7] : memref<9x1x512xf32, #tpu.memory_space<vmem>>, vector<1x1x512xf32>
    %10 = vector.shape_cast %9 : vector<1x1x512xf32> to vector<1x512xf32>
    %11 = vector.broadcast %10 : vector<1x512xf32> to vector<8x512xf32>
    %12 = arith.mulf %8, %11 : vector<8x512xf32>
    %c15_i32 = arith.constant 15 : i32
    %13 = tpu.dynamic_rotate %1 by %c15_i32 dim 1 : vector<8x512xf32>, i32 -> vector<8x512xf32>
    %c2 = arith.constant 2 : index
    %c0_8 = arith.constant 0 : index
    %c0_9 = arith.constant 0 : index
    %14 = vector.load %arg2[%c2, %c0_8, %c0_9] : memref<9x1x512xf32, #tpu.memory_space<vmem>>, vector<1x1x512xf32>
    %15 = vector.shape_cast %14 : vector<1x1x512xf32> to vector<1x512xf32>
    %16 = vector.broadcast %15 : vector<1x512xf32> to vector<8x512xf32>
    %17 = arith.mulf %13, %16 : vector<8x512xf32>
    %c1_i32 = arith.constant 1 : i32
    %18 = tpu.dynamic_rotate %1 by %c1_i32 dim 1 : vector<8x512xf32>, i32 -> vector<8x512xf32>
    %c3 = arith.constant 3 : index
    %c0_10 = arith.constant 0 : index
    %c0_11 = arith.constant 0 : index
    %19 = vector.load %arg2[%c3, %c0_10, %c0_11] : memref<9x1x512xf32, #tpu.memory_space<vmem>>, vector<1x1x512xf32>
    %20 = vector.shape_cast %19 : vector<1x1x512xf32> to vector<1x512xf32>
    %21 = vector.broadcast %20 : vector<1x512xf32> to vector<8x512xf32>
    %22 = arith.mulf %18, %21 : vector<8x512xf32>
    %c4 = arith.constant 4 : index
    %c0_12 = arith.constant 0 : index
    %c0_13 = arith.constant 0 : index
    %23 = vector.load %arg2[%c4, %c0_12, %c0_13] : memref<9x1x512xf32, #tpu.memory_space<vmem>>, vector<1x1x512xf32>
    %24 = vector.shape_cast %23 : vector<1x1x512xf32> to vector<1x512xf32>
    %25 = vector.broadcast %24 : vector<1x512xf32> to vector<8x512xf32>
    %26 = arith.mulf %1, %25 : vector<8x512xf32>
    %c511_i32 = arith.constant 511 : i32
    %27 = tpu.dynamic_rotate %1 by %c511_i32 dim 1 : vector<8x512xf32>, i32 -> vector<8x512xf32>
    %c5 = arith.constant 5 : index
    %c0_14 = arith.constant 0 : index
    %c0_15 = arith.constant 0 : index
    %28 = vector.load %arg2[%c5, %c0_14, %c0_15] : memref<9x1x512xf32, #tpu.memory_space<vmem>>, vector<1x1x512xf32>
    %29 = vector.shape_cast %28 : vector<1x1x512xf32> to vector<1x512xf32>
    %30 = vector.broadcast %29 : vector<1x512xf32> to vector<8x512xf32>
    %31 = arith.mulf %27, %30 : vector<8x512xf32>
    %c497_i32 = arith.constant 497 : i32
    %32 = tpu.dynamic_rotate %1 by %c497_i32 dim 1 : vector<8x512xf32>, i32 -> vector<8x512xf32>
    %c6 = arith.constant 6 : index
    %c0_16 = arith.constant 0 : index
    %c0_17 = arith.constant 0 : index
    %33 = vector.load %arg2[%c6, %c0_16, %c0_17] : memref<9x1x512xf32, #tpu.memory_space<vmem>>, vector<1x1x512xf32>
    %34 = vector.shape_cast %33 : vector<1x1x512xf32> to vector<1x512xf32>
    %35 = vector.broadcast %34 : vector<1x512xf32> to vector<8x512xf32>
    %36 = arith.mulf %32, %35 : vector<8x512xf32>
    %c496_i32 = arith.constant 496 : i32
    %37 = tpu.dynamic_rotate %1 by %c496_i32 dim 1 : vector<8x512xf32>, i32 -> vector<8x512xf32>
    %c7 = arith.constant 7 : index
    %c0_18 = arith.constant 0 : index
    %c0_19 = arith.constant 0 : index
    %38 = vector.load %arg2[%c7, %c0_18, %c0_19] : memref<9x1x512xf32, #tpu.memory_space<vmem>>, vector<1x1x512xf32>
    %39 = vector.shape_cast %38 : vector<1x1x512xf32> to vector<1x512xf32>
    %40 = vector.broadcast %39 : vector<1x512xf32> to vector<8x512xf32>
    %41 = arith.mulf %37, %40 : vector<8x512xf32>
    %c495_i32 = arith.constant 495 : i32
    %42 = tpu.dynamic_rotate %1 by %c495_i32 dim 1 : vector<8x512xf32>, i32 -> vector<8x512xf32>
    %c8 = arith.constant 8 : index
    %c0_20 = arith.constant 0 : index
    %c0_21 = arith.constant 0 : index
    %43 = vector.load %arg2[%c8, %c0_20, %c0_21] : memref<9x1x512xf32, #tpu.memory_space<vmem>>, vector<1x1x512xf32>
    %44 = vector.shape_cast %43 : vector<1x1x512xf32> to vector<1x512xf32>
    %45 = vector.broadcast %44 : vector<1x512xf32> to vector<8x512xf32>
    %46 = arith.mulf %42, %45 : vector<8x512xf32>
    %47 = tpu.concatenate %7, %12, %17, %22, %26, %31, %36, %41, %46 in 0 : vector<8x512xf32>, vector<8x512xf32>, vector<8x512xf32>, vector<8x512xf32>, vector<8x512xf32>, vector<8x512xf32>, vector<8x512xf32>, vector<8x512xf32>, vector<8x512xf32> -> vector<72x512xf32>
    %48 = arith.truncf %47 : vector<72x512xf32> to vector<72x512xbf16>
    %cst = arith.constant dense<0.000000e+00> : vector<8x512xf32>
    %49 = tpu.matmul %2, %48, %cst {dimension_numbers = #tpu.dot_dimension_numbers<[1], [0], [0], [1], [0, 0, 1, 1], [], []>} : vector<8x72xbf16>, vector<72x512xbf16>, vector<8x512xf32> -> vector<8x512xf32>
    %c0_22 = arith.constant 0 : index
    %c0_23 = arith.constant 0 : index
    %50 = vector.load %arg4[%c0_22, %c0_23] : memref<8x1xf32, #tpu.memory_space<vmem>>, vector<8x1xf32>
    %51 = vector.broadcast %50 : vector<8x1xf32> to vector<8x512xf32>
    %52 = arith.addf %49, %51 : vector<8x512xf32>
    %cst_24 = arith.constant 0.000000e+00 : f32
    %53 = vector.broadcast %cst_24 : f32 to vector<8x512xf32>
    %54 = arith.maximumf %52, %53 : vector<8x512xf32>
    %c0_25 = arith.constant 0 : index
    %c0_26 = arith.constant 0 : index
    %55 = vector.load %arg5[%c0_25, %c0_26] : memref<8x72xbf16, #tpu.memory_space<vmem>>, vector<8x72xbf16>
    %c17_i32_27 = arith.constant 17 : i32
    %56 = tpu.dynamic_rotate %54 by %c17_i32_27 dim 1 : vector<8x512xf32>, i32 -> vector<8x512xf32>
    %c0_28 = arith.constant 0 : index
    %c0_29 = arith.constant 0 : index
    %c0_30 = arith.constant 0 : index
    %57 = vector.load %arg2[%c0_28, %c0_29, %c0_30] : memref<9x1x512xf32, #tpu.memory_space<vmem>>, vector<1x1x512xf32>
    %58 = vector.shape_cast %57 : vector<1x1x512xf32> to vector<1x512xf32>
    %59 = vector.broadcast %58 : vector<1x512xf32> to vector<8x512xf32>
    %60 = arith.mulf %56, %59 : vector<8x512xf32>
    %c16_i32_31 = arith.constant 16 : i32
    %61 = tpu.dynamic_rotate %54 by %c16_i32_31 dim 1 : vector<8x512xf32>, i32 -> vector<8x512xf32>
    %c1_32 = arith.constant 1 : index
    %c0_33 = arith.constant 0 : index
    %c0_34 = arith.constant 0 : index
    %62 = vector.load %arg2[%c1_32, %c0_33, %c0_34] : memref<9x1x512xf32, #tpu.memory_space<vmem>>, vector<1x1x512xf32>
    %63 = vector.shape_cast %62 : vector<1x1x512xf32> to vector<1x512xf32>
    %64 = vector.broadcast %63 : vector<1x512xf32> to vector<8x512xf32>
    %65 = arith.mulf %61, %64 : vector<8x512xf32>
    %c15_i32_35 = arith.constant 15 : i32
    %66 = tpu.dynamic_rotate %54 by %c15_i32_35 dim 1 : vector<8x512xf32>, i32 -> vector<8x512xf32>
    %c2_36 = arith.constant 2 : index
    %c0_37 = arith.constant 0 : index
    %c0_38 = arith.constant 0 : index
    %67 = vector.load %arg2[%c2_36, %c0_37, %c0_38] : memref<9x1x512xf32, #tpu.memory_space<vmem>>, vector<1x1x512xf32>
    %68 = vector.shape_cast %67 : vector<1x1x512xf32> to vector<1x512xf32>
    %69 = vector.broadcast %68 : vector<1x512xf32> to vector<8x512xf32>
    %70 = arith.mulf %66, %69 : vector<8x512xf32>
    %c1_i32_39 = arith.constant 1 : i32
    %71 = tpu.dynamic_rotate %54 by %c1_i32_39 dim 1 : vector<8x512xf32>, i32 -> vector<8x512xf32>
    %c3_40 = arith.constant 3 : index
    %c0_41 = arith.constant 0 : index
    %c0_42 = arith.constant 0 : index
    %72 = vector.load %arg2[%c3_40, %c0_41, %c0_42] : memref<9x1x512xf32, #tpu.memory_space<vmem>>, vector<1x1x512xf32>
    %73 = vector.shape_cast %72 : vector<1x1x512xf32> to vector<1x512xf32>
    %74 = vector.broadcast %73 : vector<1x512xf32> to vector<8x512xf32>
    %75 = arith.mulf %71, %74 : vector<8x512xf32>
    %c4_43 = arith.constant 4 : index
    %c0_44 = arith.constant 0 : index
    %c0_45 = arith.constant 0 : index
    %76 = vector.load %arg2[%c4_43, %c0_44, %c0_45] : memref<9x1x512xf32, #tpu.memory_space<vmem>>, vector<1x1x512xf32>
    %77 = vector.shape_cast %76 : vector<1x1x512xf32> to vector<1x512xf32>
    %78 = vector.broadcast %77 : vector<1x512xf32> to vector<8x512xf32>
    %79 = arith.mulf %54, %78 : vector<8x512xf32>
    %c511_i32_46 = arith.constant 511 : i32
    %80 = tpu.dynamic_rotate %54 by %c511_i32_46 dim 1 : vector<8x512xf32>, i32 -> vector<8x512xf32>
    %c5_47 = arith.constant 5 : index
    %c0_48 = arith.constant 0 : index
    %c0_49 = arith.constant 0 : index
    %81 = vector.load %arg2[%c5_47, %c0_48, %c0_49] : memref<9x1x512xf32, #tpu.memory_space<vmem>>, vector<1x1x512xf32>
    %82 = vector.shape_cast %81 : vector<1x1x512xf32> to vector<1x512xf32>
    %83 = vector.broadcast %82 : vector<1x512xf32> to vector<8x512xf32>
    %84 = arith.mulf %80, %83 : vector<8x512xf32>
    %c497_i32_50 = arith.constant 497 : i32
    %85 = tpu.dynamic_rotate %54 by %c497_i32_50 dim 1 : vector<8x512xf32>, i32 -> vector<8x512xf32>
    %c6_51 = arith.constant 6 : index
    %c0_52 = arith.constant 0 : index
    %c0_53 = arith.constant 0 : index
    %86 = vector.load %arg2[%c6_51, %c0_52, %c0_53] : memref<9x1x512xf32, #tpu.memory_space<vmem>>, vector<1x1x512xf32>
    %87 = vector.shape_cast %86 : vector<1x1x512xf32> to vector<1x512xf32>
    %88 = vector.broadcast %87 : vector<1x512xf32> to vector<8x512xf32>
    %89 = arith.mulf %85, %88 : vector<8x512xf32>
    %c496_i32_54 = arith.constant 496 : i32
    %90 = tpu.dynamic_rotate %54 by %c496_i32_54 dim 1 : vector<8x512xf32>, i32 -> vector<8x512xf32>
    %c7_55 = arith.constant 7 : index
    %c0_56 = arith.constant 0 : index
    %c0_57 = arith.constant 0 : index
    %91 = vector.load %arg2[%c7_55, %c0_56, %c0_57] : memref<9x1x512xf32, #tpu.memory_space<vmem>>, vector<1x1x512xf32>
    %92 = vector.shape_cast %91 : vector<1x1x512xf32> to vector<1x512xf32>
    %93 = vector.broadcast %92 : vector<1x512xf32> to vector<8x512xf32>
    %94 = arith.mulf %90, %93 : vector<8x512xf32>
    %c495_i32_58 = arith.constant 495 : i32
    %95 = tpu.dynamic_rotate %54 by %c495_i32_58 dim 1 : vector<8x512xf32>, i32 -> vector<8x512xf32>
    %c8_59 = arith.constant 8 : index
    %c0_60 = arith.constant 0 : index
    %c0_61 = arith.constant 0 : index
    %96 = vector.load %arg2[%c8_59, %c0_60, %c0_61] : memref<9x1x512xf32, #tpu.memory_space<vmem>>, vector<1x1x512xf32>
    %97 = vector.shape_cast %96 : vector<1x1x512xf32> to vector<1x512xf32>
    %98 = vector.broadcast %97 : vector<1x512xf32> to vector<8x512xf32>
    %99 = arith.mulf %95, %98 : vector<8x512xf32>
    %100 = tpu.concatenate %60, %65, %70, %75, %79, %84, %89, %94, %99 in 0 : vector<8x512xf32>, vector<8x512xf32>, vector<8x512xf32>, vector<8x512xf32>, vector<8x512xf32>, vector<8x512xf32>, vector<8x512xf32>, vector<8x512xf32>, vector<8x512xf32> -> vector<72x512xf32>
    %101 = arith.truncf %100 : vector<72x512xf32> to vector<72x512xbf16>
    %cst_62 = arith.constant dense<0.000000e+00> : vector<8x512xf32>
    %102 = tpu.matmul %55, %101, %cst_62 {dimension_numbers = #tpu.dot_dimension_numbers<[1], [0], [0], [1], [0, 0, 1, 1], [], []>} : vector<8x72xbf16>, vector<72x512xbf16>, vector<8x512xf32> -> vector<8x512xf32>
    %c0_63 = arith.constant 0 : index
    %c0_64 = arith.constant 0 : index
    %103 = vector.load %arg6[%c0_63, %c0_64] : memref<8x1xf32, #tpu.memory_space<vmem>>, vector<8x1xf32>
    %104 = vector.broadcast %103 : vector<8x1xf32> to vector<8x512xf32>
    %105 = arith.addf %102, %104 : vector<8x512xf32>
    %cst_65 = arith.constant 0.000000e+00 : f32
    %106 = vector.broadcast %cst_65 : f32 to vector<8x512xf32>
    %107 = arith.maximumf %105, %106 : vector<8x512xf32>
    %108 = arith.truncf %107 : vector<8x512xf32> to vector<8x512xbf16>
    %c0_66 = arith.constant 0 : index
    %c0_67 = arith.constant 0 : index
    %109 = vector.load %arg7[%c0_66, %c0_67] : memref<8x512xbf16, #tpu.memory_space<vmem>>, vector<8x512xbf16>
    tpu.vector_store %arg7[%c0_66, %c0_67], %108 {strides = array<i32>} : memref<8x512xbf16, #tpu.memory_space<vmem>>, vector<8x512xbf16>,
    return
  }
  func.func @transform_0(%arg0: i32) -> (i32, i32) {
    %c0_i32 = arith.constant 0 : i32
    %c0_i32_0 = arith.constant 0 : i32
    return %c0_i32, %arg0 : i32, i32
  }
  func.func @transform_1(%arg0: i32) -> (i32, i32, i32) {
    %c0_i32 = arith.constant 0 : i32
    %c0_i32_0 = arith.constant 0 : i32
    %c0_i32_1 = arith.constant 0 : i32
    %c0_i32_2 = arith.constant 0 : i32
    return %c0_i32, %c0_i32_0, %c0_i32_1 : i32, i32, i32
  }
  func.func @transform_2(%arg0: i32) -> (i32, i32) {
    %c0_i32 = arith.constant 0 : i32
    %c0_i32_0 = arith.constant 0 : i32
    %c0_i32_1 = arith.constant 0 : i32
    return %c0_i32, %c0_i32_0 : i32, i32
  }
  func.func @transform_3(%arg0: i32) -> (i32, i32) {
    %c0_i32 = arith.constant 0 : i32
    %c0_i32_0 = arith.constant 0 : i32
    %c0_i32_1 = arith.constant 0 : i32
    return %c0_i32, %c0_i32_0 : i32, i32
  }
  func.func @transform_4(%arg0: i32) -> (i32, i32) {
    %c0_i32 = arith.constant 0 : i32
    %c0_i32_0 = arith.constant 0 : i32
    %c0_i32_1 = arith.constant 0 : i32
    return %c0_i32, %c0_i32_0 : i32, i32
  }
  func.func @transform_5(%arg0: i32) -> (i32, i32) {
    %c0_i32 = arith.constant 0 : i32
    %c0_i32_0 = arith.constant 0 : i32
    %c0_i32_1 = arith.constant 0 : i32
    return %c0_i32, %c0_i32_0 : i32, i32
  }
  func.func @transform_6(%arg0: i32) -> (i32, i32) {
    %c0_i32 = arith.constant 0 : i32
    %c0_i32_0 = arith.constant 0 : i32
    return %c0_i32, %arg0 : i32, i32
  }
}

</mosaic_0001>

<bundles_post_ra>
// kernel: tpu_custom_call.1
= control target key start
LH: loop header
LB: loop body
LE: loop exit
PB: predicated region body
PF: predicated region fallthrough
CT: control target
= control target key end

     0   :  { %11 = vsyncpa [#allocation3], 0  ;;  %s1537_s0 = inlined_call_operand.vmem [shape: bf16[8,512], index: 0, kind: input, shape index: {}]   ;;  %s1538_s1 = inlined_call_operand.hbm [shape: f32[9,1,512], index: 1, kind: input, shape index: {}]   ;;  %s1539_s2 = inlined_call_operand.vmem [shape: bf16[8,72], index: 2, kind: input, shape index: {}]   ;;  %s1540_s3 = inlined_call_operand.vmem [shape: f32[8,1], index: 3, kind: input, shape index: {}]   ;;  %s1541_s4 = inlined_call_operand.vmem [shape: bf16[8,72], index: 4, kind: input, shape index: {}]   ;;  %s1542_s5 = inlined_call_operand.vmem [shape: f32[8,1], index: 5, kind: input, shape index: {}]   ;;  %s1543_s6 = inlined_call_operand.hbm [shape: bf16[8,512], index: 6, kind: output, shape index: {}]  }
   0x1   :  { %12 = vsyncpa [#allocation4], 0  ;;  %s970_s21 = smov [#allocation2]   ;;  %s922_s25 = scalar_lea.hbm %s1538_s1, 576 }
   0x2   :  { %s20_s22 = sshll.u32 %s970_s21, 4  ;;  %p923_p0 = scmp.ne.s32.totalorder %s1538_s1, %s922_s25  ;;  %s21_s22 = int_to_ptr.vmem [resolvable:$true] %s20_s22 }
   0x3   :  { %p926_p1 = scmp.lt.u32.totalorder %s922_s25, %s1538_s1 }
   0x5   :  { %p928_p2 = pnand %p926_p1, %p923_p0 }
   0x7   :  { %931 = shalt.err (!%p928_p2)
}
   0x8   :  { %s932_s30 = scalar_lea.vmem %s21_s22, 576  ;;  %p937_p4 = scmp.lt.s32.totalorder %s21_s22, %s21_s22 }
   0x9   :  { %p933_p3 = scmp.ne.s32.totalorder %s21_s22, %s932_s30  ;;  %p938_p5 = scmp.lt.s32.totalorder %s932_s30, %s932_s30 }
   0xb   :  { %p939_p6 = por %p938_p5, %p937_p4 }
   0xd   :  { %p940_p7 = pnand %p939_p6, %p933_p3 }
   0xf   :  { %943 = shalt.err (!%p940_p7)
}
  0x10   :  { %s971_s7 = smov 64   ;;  %s972_s8 = smov 4  }
  0x11   :  { %26 = dma.hbm_to_vmem [thread:$0]  %s1538_s1, 576, %s21_s22, [#allocation3], %s971_s7, %s971_s7, %s972_s8  }
  0x12   :  { %966 = dma.done.wait [#allocation3], 576  }
  0x13   :  { %967 = vsyncadd [#allocation3], 4294966720  ;;  %v1033_v0 = vld [vmem:[%s1537_s0] sm:$0xff]  ;;  %v1038_v1 = vld [vmem:[%s1537_s0 + $0x8] sm:$0xff]  ;;  %s973_s1 = smov 16   ;;  %s974_s15 = smov 17   ;;  %v54_v10 = vlaneseq }
  0x14   :  { %v41_v2 = vunpack.c.l.bf16 %v1033_v0  ;;  %v42_v3 = vunpack.c.h.bf16 %v1033_v0  ;;  %v43_v4 = vunpack.c.l.bf16 %v1038_v1  ;;  %v44_v5 = vunpack.c.h.bf16 %v1038_v1  ;;  %s975_s0 = smov 15   ;;  %s976_s16 = smov 1   ;;  %v414_v9 = vld [vmem:[%s1540_s3] sm:$0xff]  ;;  %v208_v19 = vld [vmem:[#allocation2 + $0x10] sm:$0xf] }
  0x15   :  { %s977_s17 = smov 127   ;;  %s978_s18 = smov 113   ;;  %v1544_v8 = vmov 0   ;;  %v64_v11 = vshrl.u32 %v54_v10, 7  ;;  %v1074_v12 = vand.u32 127, %v54_v10  ;;  %vm424_vm8 = vcmask 1043456  }
  0x16   :  { %v851_v6 = vpack.i.bf16 %v42_v3, %v41_v2  ;;  %v856_v7 = vpack.i.bf16 %v44_v5, %v43_v4  ;;  %s979_s19 = smov 112   ;;  %469 = vmatprep.mubr.bf16.mxu0 %v1544_v8  ;;  %510 = vmatprep.mubr.bf16.mxu1 %v1544_v8  ;;  %s981_s20 = smov 111   ;;  %v61_v15 = vld [vmem:[#allocation2] sm:$0xf]  ;;  %v101_v16 = vld [vmem:[#allocation2 + $0x4] sm:$0xf] }
  0x17   :  { %921 = vset.pattern.permute.xlu0 %v1544_v8  ;;  %v1076_v13 = vsub.s32 1, %v64_v11  ;;  %v1078_v14 = vsub.s32 0, %v64_v11  ;;  %v1080_v17 = vsub.s32 3, %v64_v11  ;;  %v1082_v18 = vsub.s32 2, %v64_v11  ;;  %v141_v23 = vld [vmem:[#allocation2 + $0x8] sm:$0xf] }
  0x18   :  { %852 = vrot.lane.b32.xlu1 %v851_v6, %s973_s1  ;;  %842 = vrot.lane.b32.xlu0 %v851_v6, %s974_s15  ;;  %vm56_vm0 = vcmp.lt.s32.totalorder %v1074_v12, 17  ;;  %vm95_vm1 = vcmp.lt.s32.totalorder %v1074_v12, 16  ;;  %v181_v24 = vld [vmem:[#allocation2 + $0xc] sm:$0xf]  ;;  %v248_v31 = vld [vmem:[#allocation2 + $0x14] sm:$0xf] }
  0x19   :  { %v1086_v20 = vrot.slane %v61_v15, %v1076_v13  ;;  %v1090_v21 = vrot.slane %v101_v16, %v1076_v13  ;;  %v1093_v22 = vrot.slane %v61_v15, %v1078_v14  ;;  %v1096_v25 = vrot.slane %v101_v16, %v1078_v14  ;;  %v288_v46 = vld [vmem:[#allocation2 + $0x18] sm:$0xf]  ;;  %v1174_v53 = vld [vmem:[#allocation2 + $0x20] sm:$0xf]  ;;  %v328_v58 = vld [vmem:[#allocation2 + $0x1c] sm:$0xf] }
  0x1a   :  { %v1099_v26 = vrot.slane %v61_v15, %v1080_v17  ;;  %v1102_v27 = vrot.slane %v101_v16, %v1080_v17  ;;  %v1105_v28 = vrot.slane %v61_v15, %v1082_v18  ;;  %v1108_v29 = vrot.slane %v101_v16, %v1082_v18 }
  0x1b   :  { %v1111_v30 = vrot.slane %v208_v19, %v1076_v13  ;;  %v1114_v32 = vrot.slane %v208_v19, %v1080_v17  ;;  %v1117_v33 = vrot.slane %v208_v19, %v1078_v14  ;;  %v1120_v34 = vrot.slane %v141_v23, %v1076_v13 }
  0x1c   :  { %857 = vrot.lane.b32.xlu1 %v856_v7, %s973_s1  ;;  %847 = vrot.lane.b32.xlu0 %v856_v7, %s974_s15  ;;  %v1123_v35 = vrot.slane %v181_v24, %v1076_v13  ;;  %v1126_v36 = vrot.slane %v141_v23, %v1080_v17  ;;  %v1129_v37 = vrot.slane %v181_v24, %v1080_v17  ;;  %vm135_vm2 = vcmp.lt.s32.totalorder %v1074_v12, 15 }
  0x1d   :  { %1549 = vst [vmem:[#allocation8_spill] sm:$0xff] %v1111_v30  ;;  %1550 = vst [vmem:[#allocation9_spill] sm:$0xff] %v1114_v32  ;;  %v1132_v38 = vrot.slane %v141_v23, %v1078_v14  ;;  %v1135_v39 = vrot.slane %v181_v24, %v1078_v14  ;;  %v1138_v40 = vrot.slane %v141_v23, %v1082_v18  ;;  %vm175_vm3 = vcmp.lt.s32.totalorder %v1074_v12, 1 }
  0x1e   :  { %v1141_v41 = vrot.slane %v208_v19, %v1082_v18  ;;  %v1144_v42 = vrot.slane %v181_v24, %v1082_v18  ;;  %v1147_v43 = vrot.slane %v248_v31, %v1076_v13  ;;  %v1150_v44 = vrot.slane %v248_v31, %v1080_v17 }
  0x1f   :  { %v1153_v45 = vrot.slane %v248_v31, %v1078_v14  ;;  %v1159_v49 = vmul.f32 %v1111_v30, %v42_v3  ;;  %v1164_v50 = vmul.f32 %v1114_v32, %v44_v5  ;;  %v1169_v51 = vmul.f32 %v1117_v33, %v41_v2 }
  0x20   :  { %867 = vrot.lane.b32.xlu1 %v856_v7, %s975_s0  ;;  %862 = vrot.lane.b32.xlu0 %v851_v6, %s975_s0  ;;  %1551 = vst [vmem:[#allocation10_spill] sm:$0xff] %v1141_v41  ;;  %v1172_v52 = vrot.slane %v248_v31, %v1082_v18  ;;  %v1179_v59 = vmul.f32 %v1141_v41, %v43_v4  ;;  %vm242_vm4 = vcmp.lt.s32.totalorder %v1074_v12, 127  ;;  %vm282_vm5 = vcmp.lt.s32.totalorder %v1074_v12, 113 }
  0x21   :  { %v1182_v60 = vrot.slane %v288_v46, %v1076_v13  ;;  %v1185_v61 = vrot.slane %v288_v46, %v1080_v17  ;;  %v1188_v62 = vrot.slane %v288_v46, %v1078_v14  ;;  %v1196_v1 = vrot.slane %v1174_v53, %v1076_v13 }
  0x22   :  { %v1199_v2 = vrot.slane %v288_v46, %v1082_v18  ;;  %v1212_v23 = vrot.slane %v328_v58, %v1080_v17  ;;  %v1215_v24 = vrot.slane %v328_v58, %v1078_v14  ;;  %v1218_v31 = vrot.slane %v328_v58, %v1082_v18 }
  0x23   :  { %vm322_vm6 = vcmp.lt.s32.totalorder %v1074_v12, 112  ;;  %vm362_vm7 = vcmp.lt.s32.totalorder %v1074_v12, 111  ;;  %vm420_vm9 = vcmask 588800  }
  0x24   :  { %877 = vrot.lane.b32.xlu1 %v856_v7, %s976_s16  ;;  %872 = vrot.lane.b32.xlu0 %v851_v6, %s976_s16 }
  0x28   :  { %887 = vrot.lane.b32.xlu1 %v856_v7, %s977_s17  ;;  %882 = vrot.lane.b32.xlu0 %v851_v6, %s977_s17 }
  0x2c   :  { %897 = vrot.lane.b32.xlu1 %v856_v7, %s978_s18  ;;  %892 = vrot.lane.b32.xlu0 %v851_v6, %s978_s18 }
  0x30   :  { %907 = vrot.lane.b32.xlu1 %v856_v7, %s979_s19  ;;  %902 = vrot.lane.b32.xlu0 %v851_v6, %s979_s19 }
  0x34   :  { %917 = vrot.lane.b32.xlu1 %v856_v7, %s981_s20  ;;  %912 = vrot.lane.b32.xlu0 %v851_v6, %s981_s20  ;;  %v1206_v7 = vrot.slane %v1174_v53, %v1080_v17 }
  0x38   :  { %417 = vperm.xlu0 %921, %v414_v9   ;;  %v1209_v9 = vrot.slane %v328_v58, %v1076_v13 }
  0x8a   :  { %v853_v47 = vpop.permute.xlu1 %852  ;;  %v843_v48 = vpop.permute.xlu0 %842 }
  0x8b   :  { %v855_v54 = vunpack.i.h.bf16 %v853_v47  ;;  %v854_v55 = vunpack.i.l.bf16 %v853_v47  ;;  %v845_v56 = vunpack.i.h.bf16 %v843_v48  ;;  %v844_v57 = vunpack.i.l.bf16 %v843_v48 }
  0x8d   :  { %v59_v63 = vsel %vm56_vm0, %v844_v57, %v845_v56  ;;  %v98_v0 = vsel %vm95_vm1, %v854_v55, %v855_v54 }
  0x8e   :  { %v858_v3 = vpop.permute.xlu1 %857  ;;  %v848_v4 = vpop.permute.xlu0 %847  ;;  %v84_v5 = vmul.f32 %v1086_v20, %v59_v63  ;;  %v124_v6 = vmul.f32 %v1090_v21, %v98_v0 }
  0x8f   :  { %v860_v10 = vunpack.i.h.bf16 %v858_v3  ;;  %v859_v11 = vunpack.i.l.bf16 %v858_v3  ;;  %v850_v15 = vunpack.i.h.bf16 %v848_v4  ;;  %v849_v16 = vunpack.i.l.bf16 %v848_v4 }
  0x90   :  { %v395_v19 = vpack.c.bf16 %v124_v6, %v84_v5 }
  0x91   :  { %v60_v46 = vsel %vm56_vm0, %v850_v15, %v844_v57  ;;  %v99_v13 = vsel %vm95_vm1, %v860_v10, %v854_v55  ;;  %v57_v47 = vsel %vm56_vm0, %v849_v16, %v850_v15  ;;  %v96_v48 = vsel %vm95_vm1, %v859_v11, %v860_v10 }
  0x92   :  { %v868_v17 = vpop.permute.xlu1 %867  ;;  %v863_v63 = vpop.permute.xlu0 %862  ;;  %437 = vmatprep.subr.bf16.mxu0 %v395_v19  ;;  %v83_v0 = vmul.f32 %v1093_v22, %v60_v46  ;;  %v123_v58 = vmul.f32 %v1096_v25, %v99_v13  ;;  %v86_v3 = vmul.f32 %v1099_v26, %v57_v47  ;;  %v126_v57 = vmul.f32 %v1102_v27, %v96_v48 }
  0x93   :  { %v870_v55 = vunpack.i.h.bf16 %v868_v17  ;;  %v869_v4 = vunpack.i.l.bf16 %v868_v17  ;;  %v865_v5 = vunpack.i.h.bf16 %v863_v63  ;;  %v864_v6 = vunpack.i.l.bf16 %v863_v63 }
  0x94   :  { %v394_v15 = vpack.c.bf16 %v123_v58, %v83_v0  ;;  %v397_v8 = vpack.c.bf16 %v126_v57, %v86_v3  ;;  %v58_v10 = vsel %vm56_vm0, %v845_v56, %v849_v16  ;;  %v97_v19 = vsel %vm95_vm1, %v855_v54, %v859_v11 }
  0x95   :  { %v136_v46 = vsel %vm135_vm2, %v869_v4, %v870_v55  ;;  %v137_v13 = vsel %vm135_vm2, %v865_v5, %v869_v4  ;;  %v138_v47 = vsel %vm135_vm2, %v864_v6, %v865_v5  ;;  %v139_v48 = vsel %vm135_vm2, %v870_v55, %v864_v6 }
  0x96   :  { %v878_v17 = vpop.permute.xlu1 %877  ;;  %v873_v63 = vpop.permute.xlu0 %872  ;;  %438 = vmatpush1.bf16.msra.mxu0 %v394_v15  ;;  %478 = vmatprep.subr.bf16.mxu1 %v397_v8  ;;  %v85_v56 = vmul.f32 %v1105_v28, %v58_v10  ;;  %v125_v54 = vmul.f32 %v1108_v29, %v97_v19  ;;  %v164_v11 = vmul.f32 %v1120_v34, %v138_v47 }
  0x97   :  { %v880_v16 = vunpack.i.h.bf16 %v878_v17  ;;  %v879_v0 = vunpack.i.l.bf16 %v878_v17  ;;  %v875_v58 = vunpack.i.h.bf16 %v873_v63  ;;  %v874_v3 = vunpack.i.l.bf16 %v873_v63 }
  0x98   :  { %v396_v57 = vpack.c.bf16 %v125_v54, %v85_v56  ;;  %v166_v4 = vmul.f32 %v1126_v36, %v136_v46  ;;  %v163_v55 = vmul.f32 %v1132_v38, %v139_v48  ;;  %v165_v5 = vmul.f32 %v1138_v40, %v137_v13 }
  0x99   :  { %v176_v8 = vsel %vm175_vm3, %v879_v0, %v880_v16  ;;  %v177_v6 = vsel %vm175_vm3, %v875_v58, %v879_v0  ;;  %v178_v15 = vsel %vm175_vm3, %v874_v3, %v875_v58  ;;  %v179_v10 = vsel %vm175_vm3, %v880_v16, %v874_v3 }
  0x9a   :  { %479 = vmatpush1.bf16.msra.mxu1 %v396_v57  ;;  %v888_v19 = vpop.permute.xlu1 %887  ;;  %v883_v47 = vpop.permute.xlu0 %882  ;;  %v204_v46 = vmul.f32 %v1123_v35, %v178_v15  ;;  %v206_v48 = vmul.f32 %v1129_v37, %v176_v8  ;;  %v203_v13 = vmul.f32 %v1135_v39, %v179_v10  ;;  %v205_v17 = vmul.f32 %v1144_v42, %v177_v6 }
  0x9b   :  { %v890_v63 = vunpack.i.h.bf16 %v888_v19  ;;  %v889_v56 = vunpack.i.l.bf16 %v888_v19  ;;  %v885_v54 = vunpack.i.h.bf16 %v883_v47  ;;  %v884_v0 = vunpack.i.l.bf16 %v883_v47 }
  0x9c   :  { %v399_v32 = vpack.c.bf16 %v204_v46, %v164_v11  ;;  %v401_v58 = vpack.c.bf16 %v206_v48, %v166_v4  ;;  %v398_v41 = vpack.c.bf16 %v203_v13, %v163_v55  ;;  %v400_v30 = vpack.c.bf16 %v205_v17, %v165_v5 }
  0x9d   :  { %v243_v16 = vsel %vm242_vm4, %v889_v56, %v890_v63  ;;  %v244_v3 = vsel %vm242_vm4, %v885_v54, %v889_v56  ;;  %v245_v57 = vsel %vm242_vm4, %v884_v0, %v885_v54  ;;  %v246_v8 = vsel %vm242_vm4, %v890_v63, %v884_v0 }
  0x9e   :  { %v898_v6 = vpop.permute.xlu1 %897  ;;  %v893_v15 = vpop.permute.xlu0 %892  ;;  %439 = vmatprep.subr.bf16.mxu0 %v399_v32  ;;  %480 = vmatprep.subr.bf16.mxu1 %v401_v58  ;;  %v271_v11 = vmul.f32 %v1147_v43, %v244_v3  ;;  %v273_v4 = vmul.f32 %v1150_v44, %v246_v8  ;;  %v270_v55 = vmul.f32 %v1153_v45, %v245_v57 }
  0x9f   :  { %v900_v5 = vunpack.i.h.bf16 %v898_v6  ;;  %v899_v10 = vunpack.i.l.bf16 %v898_v6  ;;  %v895_v19 = vunpack.i.h.bf16 %v893_v15  ;;  %v894_v47 = vunpack.i.l.bf16 %v893_v15  ;;  %440 = vmatpush1.bf16.msra.mxu0 %v398_v41  ;;  %481 = vmatpush1.bf16.msra.mxu1 %v400_v30 }
  0xa0   :  { %v403_v46 = vpack.c.bf16 %v271_v11, %v1159_v49  ;;  %v405_v48 = vpack.c.bf16 %v273_v4, %v1164_v50  ;;  %v402_v32 = vpack.c.bf16 %v270_v55, %v1169_v51  ;;  %v272_v13 = vmul.f32 %v1172_v52, %v243_v16 }
  0xa1   :  { %v283_v17 = vsel %vm282_vm5, %v899_v10, %v900_v5  ;;  %v284_v63 = vsel %vm282_vm5, %v895_v19, %v899_v10  ;;  %v285_v56 = vsel %vm282_vm5, %v894_v47, %v895_v19  ;;  %v286_v30 = vsel %vm282_vm5, %v900_v5, %v894_v47 }
  0xa2   :  { %v908_v41 = vpop.permute.xlu1 %907  ;;  %v903_v49 = vpop.permute.xlu0 %902  ;;  %441 = vmatprep.subr.bf16.mxu0 %v403_v46  ;;  %482 = vmatprep.subr.bf16.mxu1 %v405_v48  ;;  %v404_v50 = vpack.c.bf16 %v272_v13, %v1179_v59  ;;  %v1292_v51 = vrot.slane %v1174_v53, %v1078_v14  ;;  %v1296_v54 = vrot.slane %v1174_v53, %v1082_v18 }
  0xa3   :  { %v910_v0 = vunpack.i.h.bf16 %v908_v41  ;;  %v909_v58 = vunpack.i.l.bf16 %v908_v41  ;;  %v905_v16 = vunpack.i.h.bf16 %v903_v49  ;;  %v904_v3 = vunpack.i.l.bf16 %v903_v49  ;;  %442 = vmatpush1.bf16.msra.mxu0 %v402_v32 }
  0xa4   :  { %483 = vmatpush1.bf16.msra.mxu1 %v404_v50  ;;  %v311_v57 = vmul.f32 %v1182_v60, %v284_v63  ;;  %v313_v59 = vmul.f32 %v1185_v61, %v286_v30  ;;  %v310_v8 = vmul.f32 %v1188_v62, %v285_v56  ;;  %v312_v6 = vmul.f32 %v1199_v2, %v283_v17 }
  0xa5   :  { %v323_v14 = vsel %vm322_vm6, %v909_v58, %v910_v0  ;;  %v324_v18 = vsel %vm322_vm6, %v905_v16, %v909_v58  ;;  %v325_v53 = vsel %vm322_vm6, %v904_v3, %v905_v16  ;;  %v326_v15 = vsel %vm322_vm6, %v910_v0, %v904_v3 }
  0xa6   :  { %v918_v11 = vpop.permute.xlu1 %917  ;;  %v913_v4 = vpop.permute.xlu0 %912  ;;  %v351_v55 = vmul.f32 %v1209_v9, %v324_v18  ;;  %v353_v5 = vmul.f32 %v1212_v23, %v326_v15  ;;  %v350_v10 = vmul.f32 %v1215_v24, %v325_v53  ;;  %v352_v19 = vmul.f32 %v1218_v31, %v323_v14  ;;  %v45_v53 = vld [vmem:[%s1539_s2] sm:$0xf] }
  0xa7   :  { %v920_v47 = vunpack.i.h.bf16 %v918_v11  ;;  %v919_v46 = vunpack.i.l.bf16 %v918_v11  ;;  %v915_v48 = vunpack.i.h.bf16 %v913_v4  ;;  %v914_v32 = vunpack.i.l.bf16 %v913_v4 }
  0xa8   :  { %v407_v13 = vpack.c.bf16 %v351_v55, %v311_v57  ;;  %v409_v17 = vpack.c.bf16 %v353_v5, %v313_v59  ;;  %v406_v63 = vpack.c.bf16 %v350_v10, %v310_v8  ;;  %v408_v56 = vpack.c.bf16 %v352_v19, %v312_v6 }
  0xa9   :  { %v364_v30 = vsel %vm362_vm7, %v915_v48, %v919_v46  ;;  %v366_v41 = vsel %vm362_vm7, %v920_v47, %v914_v32  ;;  %v365_v49 = vsel %vm362_vm7, %v914_v32, %v915_v48  ;;  %v363_v50 = vsel %vm362_vm7, %v919_v46, %v920_v47 }
  0xaa   :  { %v391_v0 = vmul.f32 %v1196_v1, %v364_v30  ;;  %v393_v58 = vmul.f32 %v1206_v7, %v366_v41  ;;  %443 = vmatprep.subr.bf16.mxu0 %v407_v13  ;;  %484 = vmatprep.subr.bf16.mxu1 %v409_v17  ;;  %v390_v16 = vmul.f32 %v1292_v51, %v365_v49  ;;  %v1552_v15 = vmov 0  }
  0xab   :  { %444 = vmatpush1.bf16.msra.mxu0 %v406_v63  ;;  %485 = vmatpush1.bf16.msra.mxu1 %v408_v56  ;;  %v392_v3 = vmul.f32 %v1296_v54, %v363_v50  ;;  %v676_v50 = vld [vmem:[%s1542_s5] sm:$0xff] }
  0xac   :  { %v411_v57 = vpack.c.bf16 %v391_v0, %v391_v0  ;;  %v413_v59 = vpack.c.bf16 %v393_v58, %v393_v58  ;;  %v410_v8 = vpack.c.bf16 %v390_v16, %v390_v16 }
  0xad   :  { %v412_v6 = vpack.c.bf16 %v392_v3, %v392_v3 }
  0xae   :  { %816 = vmatprep.subr.msk.bf16.mxu0 %vm424_vm8, %v411_v57  ;;  %818 = vmatprep.subr.msk.bf16.mxu1 %vm424_vm8, %v413_v59  ;;  %v426_v14 = vsel %vm424_vm8, %v410_v8, 0 }
  0xaf   :  { %446 = vmatpush1.bf16.msra.mxu0 %v426_v14  ;;  %v432_v18 = vsel %vm424_vm8, %v412_v6, 0 }
  0xb0   :  { %487 = vmatpush1.bf16.msra.mxu1 %v432_v18 }
  0xb2   :  { %817 = vmatmul.mubr.msk.bf16.vlgmr.msra.gmra.mrb[0].mxu0 %vm420_vm9, %v45_v53 }
  0xb3   :  { %819 = vmatmul.mubr.msk.bf16.vlgmr.msra.gmra.mrb[0].mxu1 %vm420_vm9, %v45_v53  ;;  %729 = vmatprep.mubr.bf16.mxu0 %v1552_v15 }
  0xb4   :  { %770 = vmatprep.mubr.bf16.mxu1 %v1552_v15 }
  0xb7   :  { %v418_v11 = vpop.permute.xlu0 %417 }
 0x185   :  { %v471_v4 = vpop.f32.mrb[0].mxu0 }
 0x186   :  { %v472_v55 = vadd.f32 %v471_v4, %v418_v11  ;;  %v512_v5 = vpop.f32.mrb[0].mxu1  ;;  %v473_v10 = vpop.f32.mrb[1].mxu0 }
 0x187   :  { %v513_v19 = vadd.f32 %v512_v5, %v418_v11  ;;  %v514_v47 = vpop.f32.mrb[1].mxu1  ;;  %v475_v46 = vpop.f32.mrb[2].mxu0  ;;  %v474_v32 = vadd.f32 %v473_v10, %v418_v11 }
 0x188   :  { %v1337_v48 = vmax.f32 %v472_v55, 0.0  ;;  %v476_v13 = vpop.f32.mrb[3].mxu0  ;;  %v516_v17 = vpop.f32.mrb[2].mxu1  ;;  %v515_v41 = vadd.f32 %v514_v47, %v418_v11 }
 0x189   :  { %v1339_v63 = vmax.f32 %v513_v19, 0.0  ;;  %v517_v56 = vpop.f32.mrb[3].mxu1  ;;  %v1345_v30 = vmax.f32 %v474_v32, 0.0 }
 0x18a   :  { %524 = vrot.lane.b32.xlu1 %v1337_v48, %s974_s15  ;;  %v1351_v49 = vmax.f32 %v515_v41, 0.0 }
 0x18b   :  { %528 = vrot.lane.b32.xlu0 %v1339_v63, %s974_s15 }
 0x18e   :  { %526 = vrot.lane.b32.xlu1 %v1345_v30, %s974_s15 }
 0x18f   :  { %540 = vrot.lane.b32.xlu0 %v1337_v48, %s973_s1 }
 0x192   :  { %530 = vrot.lane.b32.xlu1 %v1351_v49, %s974_s15 }
 0x193   :  { %544 = vrot.lane.b32.xlu0 %v1339_v63, %s973_s1 }
 0x196   :  { %542 = vrot.lane.b32.xlu1 %v1345_v30, %s973_s1 }
 0x197   :  { %556 = vrot.lane.b32.xlu0 %v1337_v48, %s975_s0 }
 0x19a   :  { %546 = vrot.lane.b32.xlu1 %v1351_v49, %s973_s1 }
 0x19b   :  { %560 = vrot.lane.b32.xlu0 %v1339_v63, %s975_s0 }
 0x19e   :  { %558 = vrot.lane.b32.xlu1 %v1345_v30, %s975_s0 }
 0x19f   :  { %572 = vrot.lane.b32.xlu0 %v1337_v48, %s976_s16 }
 0x1a2   :  { %562 = vrot.lane.b32.xlu1 %v1351_v49, %s975_s0 }
 0x1a3   :  { %576 = vrot.lane.b32.xlu0 %v1339_v63, %s976_s16 }
 0x1a6   :  { %574 = vrot.lane.b32.xlu1 %v1345_v30, %s976_s16 }
 0x1a7   :  { %592 = vrot.lane.b32.xlu0 %v1337_v48, %s977_s17 }
 0x1aa   :  { %578 = vrot.lane.b32.xlu1 %v1351_v49, %s976_s16 }
 0x1ab   :  { %596 = vrot.lane.b32.xlu0 %v1339_v63, %s977_s17 }
 0x1ae   :  { %594 = vrot.lane.b32.xlu1 %v1345_v30, %s977_s17 }
 0x1af   :  { %608 = vrot.lane.b32.xlu0 %v1337_v48, %s978_s18 }
 0x1b2   :  { %598 = vrot.lane.b32.xlu1 %v1351_v49, %s977_s17 }
 0x1b3   :  { %612 = vrot.lane.b32.xlu0 %v1339_v63, %s978_s18 }
 0x1b6   :  { %610 = vrot.lane.b32.xlu1 %v1345_v30, %s978_s18 }
 0x1b7   :  { %624 = vrot.lane.b32.xlu0 %v1337_v48, %s979_s19 }
 0x1ba   :  { %614 = vrot.lane.b32.xlu1 %v1351_v49, %s978_s18 }
 0x1bb   :  { %628 = vrot.lane.b32.xlu0 %v1339_v63, %s979_s19 }
 0x1be   :  { %626 = vrot.lane.b32.xlu1 %v1345_v30, %s979_s19 }
 0x1bf   :  { %640 = vrot.lane.b32.xlu0 %v1337_v48, %s981_s20 }
 0x1c2   :  { %630 = vrot.lane.b32.xlu1 %v1351_v49, %s979_s19 }
 0x1c3   :  { %644 = vrot.lane.b32.xlu0 %v1339_v63, %s981_s20 }
 0x1c6   :  { %642 = vrot.lane.b32.xlu1 %v1345_v30, %s981_s20 }
 0x1c7   :  { %679 = vperm.xlu0 %921, %v676_v50  }
 0x1ca   :  { %646 = vrot.lane.b32.xlu1 %v1351_v49, %s981_s20 }
 0x1fc   :  { %v525_v0 = vpop.permute.xlu1 %524 }
 0x1fd   :  { %v529_v58 = vpop.permute.xlu0 %528 }
 0x200   :  { %v527_v16 = vpop.permute.xlu1 %526 }
 0x201   :  { %v541_v3 = vpop.permute.xlu0 %540  ;;  %v534_v8 = vsel %vm56_vm0, %v525_v0, %v527_v16  ;;  %v533_v5 = vsel %vm56_vm0, %v527_v16, %v529_v58 }
 0x202   :  { %v537_v53 = vmul.f32 %v534_v8, %v1086_v20  ;;  %v538_v41 = vmul.f32 %v533_v5, %v1105_v28 }
 0x204   :  { %v531_v57 = vpop.permute.xlu1 %530 }
 0x205   :  { %v545_v59 = vpop.permute.xlu0 %544  ;;  %v532_v4 = vsel %vm56_vm0, %v529_v58, %v531_v57  ;;  %v535_v55 = vsel %vm56_vm0, %v531_v57, %v525_v0 }
 0x206   :  { %v536_v32 = vmul.f32 %v535_v55, %v1093_v22  ;;  %v539_v13 = vmul.f32 %v532_v4, %v1099_v26 }
 0x208   :  { %v543_v6 = vpop.permute.xlu1 %542 }
 0x209   :  { %v557_v14 = vpop.permute.xlu0 %556  ;;  %v550_v18 = vsel %vm95_vm1, %v541_v3, %v543_v6  ;;  %v549_v15 = vsel %vm95_vm1, %v543_v6, %v545_v59 }
 0x20a   :  { %v553_v11 = vmul.f32 %v550_v18, %v1090_v21  ;;  %v554_v47 = vmul.f32 %v549_v15, %v1108_v29 }
 0x20c   :  { %v547_v10 = vpop.permute.xlu1 %546  ;;  %v657_v19 = vpack.c.bf16 %v553_v11, %v537_v53  ;;  %v658_v58 = vpack.c.bf16 %v554_v47, %v538_v41 }
 0x20d   :  { %v561_v46 = vpop.permute.xlu0 %560  ;;  %v548_v20 = vsel %vm95_vm1, %v545_v59, %v547_v10  ;;  %v551_v21 = vsel %vm95_vm1, %v547_v10, %v541_v3 }
 0x20e   :  { %v552_v17 = vmul.f32 %v551_v21, %v1096_v25  ;;  %v555_v56 = vmul.f32 %v548_v20, %v1102_v27  ;;  %697 = vmatprep.subr.bf16.mxu0 %v657_v19 }
 0x210   :  { %v656_v50 = vpack.c.bf16 %v552_v17, %v536_v32  ;;  %v559_v29 = vpop.permute.xlu1 %558  ;;  %v659_v0 = vpack.c.bf16 %v555_v56, %v539_v13  ;;  %v588_v13 = vmul.f32 %v1337_v48, %v1117_v33 }
 0x211   :  { %v573_v16 = vpop.permute.xlu0 %572  ;;  %v566_v22 = vsel %vm135_vm2, %v557_v14, %v559_v29  ;;  %v565_v53 = vsel %vm135_vm2, %v559_v29, %v561_v46 }
 0x212   :  { %698 = vmatpush1.bf16.msra.mxu0 %v656_v50  ;;  %738 = vmatprep.subr.bf16.mxu1 %v659_v0  ;;  %v569_v28 = vmul.f32 %v566_v22, %v1120_v34  ;;  %v570_v47 = vmul.f32 %v565_v53, %v1138_v40  ;;  %v1553_v40 = vld [vmem:[#allocation8_spill] sm:$0xff]  ;;  %v1554_v0 = vld [vmem:[#allocation10_spill] sm:$0xff] }
 0x213   :  { %739 = vmatpush1.bf16.msra.mxu1 %v658_v58  ;;  %v589_v17 = vmul.f32 %v1345_v30, %v1553_v40  ;;  %v1555_v30 = vld [vmem:[#allocation9_spill] sm:$0xff] }
 0x214   :  { %v563_v3 = vpop.permute.xlu1 %562 }
 0x215   :  { %v577_v57 = vpop.permute.xlu0 %576  ;;  %v564_v6 = vsel %vm135_vm2, %v561_v46, %v563_v3  ;;  %v567_v18 = vsel %vm135_vm2, %v563_v3, %v557_v14 }
 0x216   :  { %v568_v5 = vmul.f32 %v567_v18, %v1132_v38  ;;  %v571_v10 = vmul.f32 %v564_v6, %v1126_v36 }
 0x218   :  { %v575_v26 = vpop.permute.xlu1 %574 }
 0x219   :  { %v593_v25 = vpop.permute.xlu0 %592  ;;  %v582_v27 = vsel %vm175_vm3, %v573_v16, %v575_v26  ;;  %v581_v59 = vsel %vm175_vm3, %v575_v26, %v577_v57 }
 0x21a   :  { %v585_v8 = vmul.f32 %v582_v27, %v1123_v35  ;;  %v586_v4 = vmul.f32 %v581_v59, %v1144_v42 }
 0x21c   :  { %v579_v15 = vpop.permute.xlu1 %578  ;;  %v661_v11 = vpack.c.bf16 %v585_v8, %v569_v28  ;;  %v662_v21 = vpack.c.bf16 %v586_v4, %v570_v47 }
 0x21d   :  { %v597_v55 = vpop.permute.xlu0 %596  ;;  %v580_v34 = vsel %vm175_vm3, %v577_v57, %v579_v15  ;;  %v583_v35 = vsel %vm175_vm3, %v579_v15, %v573_v16  ;;  %v591_v16 = vmul.f32 %v1351_v49, %v1555_v30 }
 0x21e   :  { %v584_v14 = vmul.f32 %v583_v35, %v1135_v39  ;;  %v587_v19 = vmul.f32 %v580_v34, %v1129_v37  ;;  %699 = vmatprep.subr.bf16.mxu0 %v661_v11 }
 0x220   :  { %v660_v46 = vpack.c.bf16 %v584_v14, %v568_v5  ;;  %v595_v42 = vpop.permute.xlu1 %594  ;;  %v663_v20 = vpack.c.bf16 %v587_v19, %v571_v10 }
 0x221   :  { %v609_v32 = vpop.permute.xlu0 %608  ;;  %v601_v38 = vsel %vm242_vm4, %v595_v42, %v597_v55  ;;  %v602_v36 = vsel %vm242_vm4, %v593_v25, %v595_v42 }
 0x222   :  { %v604_v39 = vmul.f32 %v602_v36, %v1153_v45  ;;  %v605_v37 = vmul.f32 %v601_v38, %v1147_v43  ;;  %700 = vmatpush1.bf16.msra.mxu0 %v660_v46  ;;  %740 = vmatprep.subr.bf16.mxu1 %v663_v20  ;;  %v590_v45 = vmul.f32 %v1339_v63, %v1554_v0 }
 0x223   :  { %741 = vmatpush1.bf16.msra.mxu1 %v662_v21 }
 0x224   :  { %v664_v56 = vpack.c.bf16 %v604_v39, %v588_v13  ;;  %v599_v41 = vpop.permute.xlu1 %598  ;;  %v665_v50 = vpack.c.bf16 %v605_v37, %v589_v17 }
 0x225   :  { %v613_v33 = vpop.permute.xlu0 %612  ;;  %v600_v48 = vsel %vm242_vm4, %v597_v55, %v599_v41  ;;  %v603_v29 = vsel %vm242_vm4, %v599_v41, %v593_v25 }
 0x226   :  { %v606_v43 = vmul.f32 %v600_v48, %v1172_v52  ;;  %v607_v58 = vmul.f32 %v603_v29, %v1150_v44  ;;  %701 = vmatprep.subr.bf16.mxu0 %v665_v50 }
 0x227   :  { %702 = vmatpush1.bf16.msra.mxu0 %v664_v56 }
 0x228   :  { %v666_v3 = vpack.c.bf16 %v606_v43, %v590_v45  ;;  %v611_v57 = vpop.permute.xlu1 %610  ;;  %v667_v22 = vpack.c.bf16 %v607_v58, %v591_v16 }
 0x229   :  { %v625_v26 = vpop.permute.xlu0 %624  ;;  %v617_v63 = vsel %vm282_vm5, %v611_v57, %v613_v33  ;;  %v618_v52 = vsel %vm282_vm5, %v609_v32, %v611_v57 }
 0x22a   :  { %742 = vmatprep.subr.bf16.mxu1 %v667_v22  ;;  %v620_v59 = vmul.f32 %v618_v52, %v1188_v62  ;;  %v621_v8 = vmul.f32 %v617_v63, %v1182_v60 }
 0x22b   :  { %743 = vmatpush1.bf16.msra.mxu1 %v666_v3 }
 0x22c   :  { %v615_v27 = vpop.permute.xlu1 %614 }
 0x22d   :  { %v629_v25 = vpop.permute.xlu0 %628  ;;  %v616_v15 = vsel %vm282_vm5, %v613_v33, %v615_v27  ;;  %v619_v11 = vsel %vm282_vm5, %v615_v27, %v609_v32 }
 0x22e   :  { %v622_v62 = vmul.f32 %v616_v15, %v1199_v2 }
 0x230   :  { %v627_v44 = vpop.permute.xlu1 %626 }
 0x231   :  { %v633_v28 = vsel %vm322_vm6, %v627_v44, %v629_v25  ;;  %v634_v49 = vsel %vm322_vm6, %v625_v26, %v627_v44  ;;  %v641_v6 = vpop.permute.xlu0 %640 }
 0x232   :  { %v636_v18 = vmul.f32 %v634_v49, %v1215_v24  ;;  %v637_v53 = vmul.f32 %v633_v28, %v1209_v9  ;;  %v623_v24 = vmul.f32 %v619_v11, %v1185_v61 }
 0x234   :  { %v668_v4 = vpack.c.bf16 %v636_v18, %v620_v59  ;;  %v631_v55 = vpop.permute.xlu1 %630  ;;  %v669_v34 = vpack.c.bf16 %v637_v53, %v621_v8 }
 0x235   :  { %v632_v35 = vsel %vm322_vm6, %v629_v25, %v631_v55  ;;  %v635_v60 = vsel %vm322_vm6, %v631_v55, %v625_v26  ;;  %v645_v10 = vpop.permute.xlu0 %644 }
 0x236   :  { %v638_v9 = vmul.f32 %v632_v35, %v1218_v31  ;;  %v639_v5 = vmul.f32 %v635_v60, %v1212_v23  ;;  %703 = vmatprep.subr.bf16.mxu0 %v669_v34 }
 0x237   :  { %704 = vmatpush1.bf16.msra.mxu0 %v668_v4 }
 0x238   :  { %v670_v14 = vpack.c.bf16 %v638_v9, %v622_v62  ;;  %v643_v19 = vpop.permute.xlu1 %642  ;;  %v671_v47 = vpack.c.bf16 %v639_v5, %v623_v24 }
 0x239   :  { %v649_v46 = vsel %vm362_vm7, %v643_v19, %v645_v10  ;;  %v650_v42 = vsel %vm362_vm7, %v641_v6, %v643_v19 }
 0x23a   :  { %v652_v2 = vmul.f32 %v650_v42, %v1292_v51  ;;  %v653_v61 = vmul.f32 %v649_v46, %v1196_v1  ;;  %744 = vmatprep.subr.bf16.mxu1 %v671_v47  ;;  %v523_v1 = vld [vmem:[%s1541_s4] sm:$0xf]  ;;  %s982_s4 = smov [#allocation5]  }
 0x23b   :  { %745 = vmatpush1.bf16.msra.mxu1 %v670_v14  ;;  %s807_s26 = sshll.u32 %s982_s4, 4  ;;  %s808_s26 = int_to_ptr.vmem [resolvable:$true] %s807_s26 }
 0x23c   :  { %v672_v31 = vpack.c.bf16 %v652_v2, %v652_v2  ;;  %v673_v23 = vpack.c.bf16 %v653_v61, %v653_v61  ;;  %v647_v20 = vpop.permute.xlu1 %646  ;;  %s944_s27 = scalar_lea.vmem %s808_s26, 256  ;;  %p949_p9 = scmp.lt.s32.totalorder %s808_s26, %s808_s26 }
 0x23d   :  { %v648_v21 = vsel %vm362_vm7, %v645_v10, %v647_v20  ;;  %v651_v32 = vsel %vm362_vm7, %v647_v20, %v641_v6  ;;  %p945_p8 = scmp.ne.s32.totalorder %s808_s26, %s944_s27  ;;  %p950_p10 = scmp.lt.s32.totalorder %s944_s27, %s944_s27 }
 0x23e   :  { %v654_v13 = vmul.f32 %v648_v21, %v1296_v54  ;;  %v655_v38 = vmul.f32 %v651_v32, %v1206_v7  ;;  %820 = vmatprep.subr.msk.bf16.mxu0 %vm424_vm8, %v673_v23  ;;  %v686_v51 = vsel %vm424_vm8, %v672_v31, 0 }
 0x23f   :  { %706 = vmatpush1.bf16.msra.mxu0 %v686_v51  ;;  %p951_p11 = por %p950_p10, %p949_p9 }
 0x240   :  { %v674_v36 = vpack.c.bf16 %v654_v13, %v654_v13  ;;  %v675_v39 = vpack.c.bf16 %v655_v38, %v655_v38 }
 0x241   :  { %p952_p12 = pnand %p951_p11, %p945_p8 }
 0x242   :  { %821 = vmatmul.mubr.msk.bf16.vlgmr.msra.gmra.mrb[4].mxu0 %vm420_vm9, %v523_v1  ;;  %822 = vmatprep.subr.msk.bf16.mxu1 %vm424_vm8, %v675_v39  ;;  %v692_v12 = vsel %vm424_vm8, %v674_v36, 0 }
 0x243   :  { %747 = vmatpush1.bf16.msra.mxu1 %v692_v12 }
 0x246   :  { %823 = vmatmul.mubr.msk.bf16.vlgmr.msra.gmra.mrb[4].mxu1 %vm420_vm9, %v523_v1  ;;  %v680_v7 = vpop.permute.xlu0 %679 }
 0x315   :  { %v731_v54 = vpop.f32.mrb[4].mxu0 }
 0x316   :  { %v732_v37 = vadd.f32 %v731_v54, %v680_v7  ;;  %v733_v40 = vpop.f32.mrb[5].mxu0 }
 0x317   :  { %v734_v17 = vadd.f32 %v733_v40, %v680_v7  ;;  %v735_v56 = vpop.f32.mrb[6].mxu0 }
 0x318   :  { %v779_v41 = vmax.f32 %v732_v37, 0.0  ;;  %v736_v50 = vpop.f32.mrb[7].mxu0 }
 0x319   :  { %v780_v33 = vmax.f32 %v734_v17, 0.0  ;;  %v772_v48 = vpop.f32.mrb[4].mxu1 }
 0x31a   :  { %v773_v29 = vadd.f32 %v772_v48, %v680_v7  ;;  %v774_v0 = vpop.f32.mrb[5].mxu1 }
 0x31b   :  { %v826_v45 = vpack.c.bf16 %v780_v33, %v779_v41  ;;  %v775_v43 = vadd.f32 %v774_v0, %v680_v7  ;;  %v776_v58 = vpop.f32.mrb[6].mxu1 }
 0x31c   :  { %v781_v30 = vmax.f32 %v773_v29, 0.0  ;;  %v777_v16 = vpop.f32.mrb[7].mxu1 }
 0x31d   :  { %799 = vst [vmem:[#allocation5] sm:$0xff] %v826_v45  ;;  %v782_v3 = vmax.f32 %v775_v43, 0.0 }
 0x31f   :  { %v827_v57 = vpack.c.bf16 %v782_v3, %v781_v30 }
 0x321   :  { %800 = vst [vmem:[#allocation5 + $0x8] sm:$0xff] %v827_v57 }
 0x322   :  { %955 = shalt.err (!%p952_p12)
}
 0x323   :  { %s956_s30 = scalar_lea.hbm %s1543_s6, 256 }
 0x324   :  { %p957_p13 = scmp.ne.s32.totalorder %s1543_s6, %s956_s30  ;;  %p960_p0 = scmp.lt.u32.totalorder %s956_s30, %s1543_s6 }
 0x326   :  { %p962_p1 = pnand %p960_p0, %p957_p13 }
 0x328   :  { %965 = shalt.err (!%p962_p1)
}
 0x329   :  { %810 = dma.vmem_to_hbm [thread:$0]  %s808_s26, 256, %s1543_s6, [#allocation4]  }
 0x32a   :  { %968 = dma.done.wait [#allocation4], 256  }
 0x32b   :  { %969 = vsyncadd [#allocation4], 4294967040 }
 0x32c   :  { %814 = vsyncpa [#allocation3], 1 }
 0x32d   :  { %815 = vsyncpa [#allocation4], 1 }

</bundles_post_ra>
